<compile_context>
chip_gen: v7x
topology: tpu7x:2x2x1
jax: 0.10.0
libtpu: 0.0.40
codegen_flags: <defaults>
</compile_context>

<pallas_src>
import jax
import jax.numpy as jnp
from jax.experimental import pallas as pl
from jax.experimental.pallas import tpu as pltpu

_LANES = 512          # lane-dense last dim (multiple of 128)
_MAX_TILE_ROWS = 512  # 512 x 512 x 4 B = 1 MiB per fp32 tile buffer


def _round_up(x: int, m: int) -> int:
    return ((x + m - 1) // m) * m


def _relu_kernel(x_ref, o_ref):
    # Elementwise ReLU on one VMEM tile (runs on the VPU).
    o_ref[...] = jnp.maximum(x_ref[...], jnp.zeros((), dtype=x_ref.dtype))


def relu_pallas(x: jax.Array) -> jax.Array:
    """ReLU over an arbitrary-shape tensor via a tiled, lane-dense Pallas kernel."""
    orig_shape = x.shape
    total = x.size
    dtype = x.dtype

    # Lane-dense 2-D slab: (rows, _LANES); rows tiled in multiples of 8.
    rows_raw = pl.cdiv(total, _LANES)
    tile_rows = min(_MAX_TILE_ROWS, _round_up(rows_raw, 8))
    rows = _round_up(rows_raw, tile_rows)
    padded_total = rows * _LANES

    x_flat = x.reshape(-1)
    needs_pad = padded_total != total
    if needs_pad:
        # ReLU(0) == 0, so zero padding is harmless.
        x_flat = jnp.pad(x_flat, (0, padded_total - total))
    x2d = x_flat.reshape(rows, _LANES)

    grid = (rows // tile_rows,)

    out2d = pl.pallas_call(
        _relu_kernel,
        out_shape=jax.ShapeDtypeStruct((rows, _LANES), dtype),
        grid=grid,
        in_specs=[pl.BlockSpec((tile_rows, _LANES), lambda i: (i, 0))],
        out_specs=pl.BlockSpec((tile_rows, _LANES), lambda i: (i, 0)),
        # Alias in->out (inplace ReLU) only when the slab is a fresh temporary
        # produced by the pad, so we never donate a buffer the caller may still
        # hold.
        input_output_aliases={0: 0} if needs_pad else {},
        compiler_params=pltpu.CompilerParams(
            dimension_semantics=("parallel",),
        ),
    )(x2d)

    return out2d.reshape(-1)[:total].reshape(orig_shape)


if __name__ == "__main__":
    # Deterministic input, same shape as the PyTorch module's example input.
    key = jax.random.PRNGKey(0)
    x = jax.random.normal(key, (1, 116, 14, 14), dtype=jnp.float32)

    y = relu_pallas(x)
    jax.block_until_ready(y)

    # Sanity check against plain-JAX ReLU.
    y_ref = jnp.maximum(x, 0.0)
    assert y.shape == x.shape and y.dtype == x.dtype
    assert jnp.allclose(y, y_ref), "mismatch vs reference ReLU"

    print("KERNEL_OK")
</pallas_src>

<mosaic_0001>
module attributes {stable_mosaic.version = 11 : i64} {
  func.func @_relu_kernel(%arg0: i32, %arg1: memref<48x512xf32, #tpu.memory_space<vmem>>, %arg2: memref<48x512xf32, #tpu.memory_space<vmem>>) attributes {dimension_semantics = [#tpu.dimension_semantics<parallel>], iteration_bounds = array<i64: 1>, scalar_prefetch = 0 : i64, scratch_operands = 0 : i64, tpu.core_type = #tpu.core_type<tc>, window_params = [{transform_indices = @transform_0, window_bounds = array<i64: 48, 512>}, {transform_indices = @transform_1, window_bounds = array<i64: 48, 512>}]} {
    %c0 = arith.constant 0 : index
    %c0_0 = arith.constant 0 : index
    %0 = vector.load %arg1[%c0, %c0_0] : memref<48x512xf32, #tpu.memory_space<vmem>>, vector<48x512xf32>
    %cst = arith.constant 0.000000e+00 : f32
    %1 = vector.broadcast %cst : f32 to vector<48x512xf32>
    %2 = arith.maximumf %0, %1 : vector<48x512xf32>
    %c0_1 = arith.constant 0 : index
    %c0_2 = arith.constant 0 : index
    %3 = vector.load %arg2[%c0_1, %c0_2] : memref<48x512xf32, #tpu.memory_space<vmem>>, vector<48x512xf32>
    tpu.vector_store %arg2[%c0_1, %c0_2], %2 {strides = array<i32>} : memref<48x512xf32, #tpu.memory_space<vmem>>, vector<48x512xf32>,
    return
  }
  func.func @transform_0(%arg0: i32) -> (i32, i32) {
    %c0_i32 = arith.constant 0 : i32
    %c0_i32_0 = arith.constant 0 : i32
    return %arg0, %c0_i32 : i32, i32
  }
  func.func @transform_1(%arg0: i32) -> (i32, i32) {
    %c0_i32 = arith.constant 0 : i32
    %c0_i32_0 = arith.constant 0 : i32
    return %arg0, %c0_i32 : i32, i32
  }
}

</mosaic_0001>

<bundles_post_ra>
// kernel: tpu_custom_call.1
= control target key start
LH: loop header
LB: loop body
LE: loop exit
PB: predicated region body
PF: predicated region fallthrough
CT: control target
= control target key end

     0   :  { %6 = vsyncpa [#allocation3], 0  ;;  %s211_s0 = inlined_call_operand.hbm [shape: f32[48,512], index: 0, kind: input, shape index: {}, may-alias: {0,1}]   ;;  %s212_s1 = inlined_call_operand.hbm [shape: f32[48,512], index: 1, kind: output, shape index: {}, may-alias: {0,1}]  }
   0x1   :  { %7 = vsyncpa [#allocation4], 0  ;;  %s164_s6 = smov [#allocation2]   ;;  %s116_s10 = scalar_lea.hbm %s211_s0, 3072 }
   0x2   :  { %s13_s7 = sshll.u32 %s164_s6, 4  ;;  %p117_p0 = scmp.ne.s32.totalorder %s211_s0, %s116_s10  ;;  %s14_s7 = int_to_ptr.vmem [resolvable:$true] %s13_s7 }
   0x3   :  { %p120_p1 = scmp.lt.u32.totalorder %s116_s10, %s211_s0 }
   0x5   :  { %p122_p2 = pnand %p120_p1, %p117_p0 }
   0x7   :  { %125 = shalt.err (!%p122_p2)
}
   0x8   :  { %s126_s15 = scalar_lea.vmem %s14_s7, 3072  ;;  %p131_p4 = scmp.lt.s32.totalorder %s14_s7, %s14_s7 }
   0x9   :  { %p127_p3 = scmp.ne.s32.totalorder %s14_s7, %s126_s15  ;;  %p132_p5 = scmp.lt.s32.totalorder %s126_s15, %s126_s15 }
   0xb   :  { %p133_p6 = por %p132_p5, %p131_p4 }
   0xd   :  { %p134_p7 = pnand %p133_p6, %p127_p3 }
   0xf   :  { %137 = shalt.err (!%p134_p7)
}
  0x10   :  { %s165_s16 = smov 512   ;;  %s166_s17 = smov 32  }
  0x11   :  { %19 = dma.hbm_to_vmem [thread:$0]  %s211_s0, 3072, %s14_s7, [#allocation3], %s165_s16, %s165_s16, %s166_s17  }
  0x12   :  { %160 = dma.done.wait [#allocation3], 3072  }
  0x13   :  { %161 = vsyncadd [#allocation3], 4294964224  ;;  %v23_v0 = vld [vmem:[#allocation2] sm:$0xff]  ;;  %v24_v1 = vld [vmem:[#allocation2 + $0x8] sm:$0xff]  ;;  %s167_s20 = smov [#allocation5]  }
  0x14   :  { %v25_v2 = vld [vmem:[#allocation2 + $0x10] sm:$0xff]  ;;  %s193_s21 = sshll.u32 %s167_s20, 4  ;;  %v47_v3 = vmax.f32 %v23_v0, 0.0  ;;  %v48_v4 = vmax.f32 %v24_v1, 0.0  ;;  %v26_v6 = vld [vmem:[#allocation2 + $0x18] sm:$0xff]  ;;  %v27_v7 = vld [vmem:[#allocation2 + $0x20] sm:$0xff]  ;;  %s101_s21 = int_to_ptr.vmem [resolvable:$true] %s193_s21 }
  0x15   :  { %v49_v5 = vmax.f32 %v25_v2, 0.0  ;;  %v28_v8 = vld [vmem:[#allocation2 + $0x28] sm:$0xff]  ;;  %v50_v9 = vmax.f32 %v26_v6, 0.0  ;;  %v51_v10 = vmax.f32 %v27_v7, 0.0  ;;  %v29_v12 = vld [vmem:[#allocation2 + $0x30] sm:$0xff]  ;;  %v30_v13 = vld [vmem:[#allocation2 + $0x38] sm:$0xff]  ;;  %p143_p9 = scmp.lt.s32.totalorder %s101_s21, %s101_s21 }
  0x16   :  { %v52_v11 = vmax.f32 %v28_v8, 0.0  ;;  %v31_v14 = vld [vmem:[#allocation2 + $0x40] sm:$0xff]  ;;  %71 = vst [vmem:[#allocation5] sm:$0xff] %v47_v3  ;;  %72 = vst [vmem:[#allocation5 + $0x8] sm:$0xff] %v48_v4  ;;  %v53_v15 = vmax.f32 %v29_v12, 0.0  ;;  %v54_v16 = vmax.f32 %v30_v13, 0.0 }
  0x17   :  { %73 = vst [vmem:[#allocation5 + $0x10] sm:$0xff] %v49_v5  ;;  %v55_v17 = vmax.f32 %v31_v14, 0.0  ;;  %v32_v18 = vld [vmem:[#allocation2 + $0x48] sm:$0xff]  ;;  %v33_v19 = vld [vmem:[#allocation2 + $0x50] sm:$0xff]  ;;  %v34_v20 = vld [vmem:[#allocation2 + $0x58] sm:$0xff]  ;;  %s138_s0 = scalar_lea.vmem %s101_s21, 3072 }
  0x18   :  { %74 = vst [vmem:[#allocation5 + $0x18] sm:$0xff] %v50_v9  ;;  %75 = vst [vmem:[#allocation5 + $0x20] sm:$0xff] %v51_v10  ;;  %v56_v21 = vmax.f32 %v32_v18, 0.0  ;;  %v57_v22 = vmax.f32 %v33_v19, 0.0  ;;  %v58_v23 = vmax.f32 %v34_v20, 0.0  ;;  %v35_v24 = vld [vmem:[#allocation2 + $0x60] sm:$0xff]  ;;  %p139_p8 = scmp.ne.s32.totalorder %s101_s21, %s138_s0  ;;  %p144_p10 = scmp.lt.s32.totalorder %s138_s0, %s138_s0 }
  0x19   :  { %76 = vst [vmem:[#allocation5 + $0x28] sm:$0xff] %v52_v11  ;;  %v36_v25 = vld [vmem:[#allocation2 + $0x68] sm:$0xff]  ;;  %v37_v26 = vld [vmem:[#allocation2 + $0x70] sm:$0xff]  ;;  %77 = vst [vmem:[#allocation5 + $0x30] sm:$0xff] %v53_v15  ;;  %v59_v27 = vmax.f32 %v35_v24, 0.0 }
  0x1a   :  { %78 = vst [vmem:[#allocation5 + $0x38] sm:$0xff] %v54_v16  ;;  %79 = vst [vmem:[#allocation5 + $0x40] sm:$0xff] %v55_v17  ;;  %v60_v28 = vmax.f32 %v36_v25, 0.0  ;;  %v61_v29 = vmax.f32 %v37_v26, 0.0  ;;  %v38_v30 = vld [vmem:[#allocation2 + $0x78] sm:$0xff]  ;;  %v39_v31 = vld [vmem:[#allocation2 + $0x80] sm:$0xff]  ;;  %p145_p11 = por %p144_p10, %p143_p9 }
  0x1b   :  { %v40_v32 = vld [vmem:[#allocation2 + $0x88] sm:$0xff]  ;;  %80 = vst [vmem:[#allocation5 + $0x48] sm:$0xff] %v56_v21  ;;  %81 = vst [vmem:[#allocation5 + $0x50] sm:$0xff] %v57_v22  ;;  %v62_v33 = vmax.f32 %v38_v30, 0.0  ;;  %v63_v34 = vmax.f32 %v39_v31, 0.0  ;;  %v41_v36 = vld [vmem:[#allocation2 + $0x90] sm:$0xff] }
  0x1c   :  { %82 = vst [vmem:[#allocation5 + $0x58] sm:$0xff] %v58_v23  ;;  %v64_v35 = vmax.f32 %v40_v32, 0.0  ;;  %v42_v37 = vld [vmem:[#allocation2 + $0x98] sm:$0xff]  ;;  %v43_v38 = vld [vmem:[#allocation2 + $0xa0] sm:$0xff]  ;;  %83 = vst [vmem:[#allocation5 + $0x60] sm:$0xff] %v59_v27  ;;  %v65_v39 = vmax.f32 %v41_v36, 0.0  ;;  %p146_p12 = pnand %p145_p11, %p139_p8 }
  0x1d   :  { %84 = vst [vmem:[#allocation5 + $0x68] sm:$0xff] %v60_v28  ;;  %85 = vst [vmem:[#allocation5 + $0x70] sm:$0xff] %v61_v29  ;;  %v66_v40 = vmax.f32 %v42_v37, 0.0  ;;  %v67_v41 = vmax.f32 %v43_v38, 0.0  ;;  %v44_v42 = vld [vmem:[#allocation2 + $0xa8] sm:$0xff]  ;;  %v45_v43 = vld [vmem:[#allocation2 + $0xb0] sm:$0xff] }
  0x1e   :  { %v46_v44 = vld [vmem:[#allocation2 + $0xb8] sm:$0xff]  ;;  %86 = vst [vmem:[#allocation5 + $0x78] sm:$0xff] %v62_v33  ;;  %87 = vst [vmem:[#allocation5 + $0x80] sm:$0xff] %v63_v34  ;;  %v68_v45 = vmax.f32 %v44_v42, 0.0  ;;  %v69_v46 = vmax.f32 %v45_v43, 0.0 }
  0x1f   :  { %88 = vst [vmem:[#allocation5 + $0x88] sm:$0xff] %v64_v35  ;;  %v70_v47 = vmax.f32 %v46_v44, 0.0  ;;  %89 = vst [vmem:[#allocation5 + $0x90] sm:$0xff] %v65_v39 }
  0x20   :  { %90 = vst [vmem:[#allocation5 + $0x98] sm:$0xff] %v66_v40  ;;  %91 = vst [vmem:[#allocation5 + $0xa0] sm:$0xff] %v67_v41 }
  0x21   :  { %92 = vst [vmem:[#allocation5 + $0xa8] sm:$0xff] %v68_v45  ;;  %93 = vst [vmem:[#allocation5 + $0xb0] sm:$0xff] %v69_v46 }
  0x22   :  { %94 = vst [vmem:[#allocation5 + $0xb8] sm:$0xff] %v70_v47 }
  0x23   :  { %149 = shalt.err (!%p146_p12)
}
  0x24   :  { %s150_s24 = scalar_lea.hbm %s212_s1, 3072 }
  0x25   :  { %p151_p13 = scmp.ne.s32.totalorder %s212_s1, %s150_s24  ;;  %p154_p0 = scmp.lt.u32.totalorder %s150_s24, %s212_s1 }
  0x27   :  { %p156_p1 = pnand %p154_p0, %p151_p13 }
  0x29   :  { %159 = shalt.err (!%p156_p1)
}
  0x2a   :  { %106 = dma.vmem_to_hbm [thread:$0]  %s101_s21, 3072, %s212_s1, [#allocation4], %s165_s16, %s165_s16, %s166_s17  }
  0x2b   :  { %162 = dma.done.wait [#allocation4], 3072  }
  0x2c   :  { %163 = vsyncadd [#allocation4], 4294964224 }
  0x2d   :  { %110 = vsyncpa [#allocation3], 1 }
  0x2e   :  { %111 = vsyncpa [#allocation4], 1 }

</bundles_post_ra>
